<compile_context>
chip_gen: v6e
topology: v6e:2x2x1
jax: 0.10.0
libtpu: 0.0.40
codegen_flags: <defaults>
</compile_context>

<pallas_src>
import functools

import jax
import jax.numpy as jnp
from jax.experimental import pallas as pl
from jax.experimental.pallas import tpu as pltpu

INPUT_DIM = 5
HIDDEN1 = 32
HIDDEN2 = 16
OUT_DIM = 1

_IN_AUG = INPUT_DIM + 1          # ones row folds b1 into the fc1 matmul
_MAX_TILE = 65536                # keeps per-step VMEM footprint well < 48 MiB
_VMEM_LIMIT = 48 * 1024 * 1024   # < v7x 64 MiB physical; ample on v5e/v6e


def _round_up(n, m):
    return ((n + m - 1) // m) * m


def _choose_tile(batch, block_batch):
    """Batch-tile size: lane-dense (multiple of 128), large enough to amortise
    per-grid-step overhead, small enough for VMEM, and capped so batches that
    span more than one minimal tile give >= 2 grid steps (v7x has 2 TensorCores
    sharding the 'parallel' axis)."""
    tb = min(_round_up(block_batch, 128), _round_up(batch, 128), _MAX_TILE)
    if batch > 128:
        tb = min(tb, _round_up((batch + 1) // 2, 128))
    return max(tb, 128)


def _mlp_kernel(xTa_ref, w1a_ref, w2_ref, b2_ref, w3c_ref, b3_ref, oT_ref):
    # xTa: (IN+1, tb)  batch in the lane axis; last row is ones (carries b1)
    # w1a: (H1, IN+1)  fc1 weight with b1 folded in as the last column
    # w2 : (H2, H1)    b2 : (H2, 1)
    # w3c: (H2, 1)     fc3 weight as a column      b3: (1, 1)
    # oT : (1, tb)     lane-dense output slab
    xTa = xTa_ref[...]

    # fc1 (+ folded bias) + ReLU        (dropout1 == identity in eval mode)
    h1 = jnp.dot(w1a_ref[...], xTa, preferred_element_type=jnp.float32)
    h1 = jnp.maximum(h1, 0.0)

    # fc2 + bias + ReLU                 (dropout2 == identity in eval mode)
    h2 = jnp.dot(w2_ref[...], h1, preferred_element_type=jnp.float32)
    h2 = jnp.maximum(h2 + b2_ref[...], 0.0)

    # fc3 on the VPU/XLU: sublane-weighted sum over the 16 hidden rows.
    out = jnp.sum(h2 * w3c_ref[...], axis=0, keepdims=True) + b3_ref[...]
    oT_ref[...] = out.astype(oT_ref.dtype)


def _forward_from_xt(xT, params, block_batch):
    """Core: xT is feature-major (INPUT_DIM, B) float32."""
    w1, b1, w2, b2, w3, b3 = params
    B = xT.shape[1]

    tb = _choose_tile(B, block_batch)
    Bp = _round_up(B, tb)
    grid = (Bp // tb,)

    # Pad the batch (lane) axis and append the ones row that carries b1.
    xTa = jnp.concatenate(
        [jnp.pad(xT.astype(jnp.float32), ((0, 0), (0, Bp - B))),
         jnp.ones((1, Bp), jnp.float32)],
        axis=0)

    w1a = jnp.concatenate([w1, b1.reshape(HIDDEN1, 1)], axis=1)   # (H1, IN+1)
    b2c = b2.reshape(HIDDEN2, 1)
    w3c = w3.reshape(OUT_DIM, HIDDEN2).T                          # (H2, 1)
    b3c = b3.reshape(OUT_DIM, 1)

    flops = 2 * Bp * (_IN_AUG * HIDDEN1 + HIDDEN1 * HIDDEN2 + HIDDEN2 * OUT_DIM)
    bytes_accessed = 4 * (
        Bp * _IN_AUG + Bp * OUT_DIM
        + HIDDEN1 * _IN_AUG + HIDDEN2 * HIDDEN1 + HIDDEN2
        + HIDDEN2 * OUT_DIM + OUT_DIM)

    outT = pl.pallas_call(
        _mlp_kernel,
        out_shape=jax.ShapeDtypeStruct((OUT_DIM, Bp), jnp.float32),
        grid_spec=pltpu.PrefetchScalarGridSpec(
            num_scalar_prefetch=0,
            grid=grid,
            in_specs=[
                # batch-tiled transposed input (lane-dense batch axis)
                pl.BlockSpec((_IN_AUG, tb), lambda i: (0, i)),
                # weights / biases: full arrays, same (0,0) block every step
                pl.BlockSpec((HIDDEN1, _IN_AUG), lambda i: (0, 0)),
                pl.BlockSpec((HIDDEN2, HIDDEN1), lambda i: (0, 0)),
                pl.BlockSpec((HIDDEN2, 1), lambda i: (0, 0)),
                pl.BlockSpec((HIDDEN2, 1), lambda i: (0, 0)),
                pl.BlockSpec((OUT_DIM, 1), lambda i: (0, 0)),
            ],
            out_specs=pl.BlockSpec((OUT_DIM, tb), lambda i: (0, i)),
        ),
        compiler_params=pltpu.CompilerParams(
            dimension_semantics=("parallel",),
            vmem_limit_bytes=_VMEM_LIMIT,
        ),
        cost_estimate=pl.CostEstimate(
            flops=flops, transcendentals=0, bytes_accessed=bytes_accessed),
    )(xTa, w1a, w2, b2c, w3c, b3c)

    # Drop batch padding; return (B, 1) like the PyTorch module.
    return outT[:, :B].T


@functools.partial(jax.jit, static_argnames=("block_batch",))
def reward_model_forward_xt(xT, params, *, block_batch=32768):
    """Forward for feature-major input xT: (INPUT_DIM, B).  Preferred entry
    point for large batches: no transpose pass over x."""
    return _forward_from_xt(xT, params, block_batch)


@functools.partial(jax.jit, static_argnames=("block_batch",))
def reward_model_forward(x, params, *, block_batch=32768):
    """Forward for PyTorch-layout input x: (B, INPUT_DIM).  Performs one
    transpose of x (an extra HBM pass); keep activations stored feature-major
    upstream and call reward_model_forward_xt to avoid it."""
    return _forward_from_xt(x.T, params, block_batch)


def init_params(key):
    """Deterministic init matching nn.Linear shapes (PyTorch layout:
    weights (out, in), biases (out,))."""
    k1, k2, k3, k4, k5, k6 = jax.random.split(key, 6)

    def uniform(k, shape, fan_in):
        bound = 1.0 / jnp.sqrt(jnp.float32(fan_in))
        return jax.random.uniform(k, shape, jnp.float32, -bound, bound)

    w1 = uniform(k1, (HIDDEN1, INPUT_DIM), INPUT_DIM)
    b1 = uniform(k2, (HIDDEN1,), INPUT_DIM)
    w2 = uniform(k3, (HIDDEN2, HIDDEN1), HIDDEN1)
    b2 = uniform(k4, (HIDDEN2,), HIDDEN1)
    w3 = uniform(k5, (OUT_DIM, HIDDEN2), HIDDEN2)
    b3 = uniform(k6, (OUT_DIM,), HIDDEN2)
    return (w1, b1, w2, b2, w3, b3)


def reference_forward(x, params):
    w1, b1, w2, b2, w3, b3 = params
    hi = jax.lax.Precision.HIGHEST
    h1 = jnp.maximum(jnp.dot(x, w1.T, precision=hi) + b1, 0.0)
    h2 = jnp.maximum(jnp.dot(h1, w2.T, precision=hi) + b2, 0.0)
    return jnp.dot(h2, w3.T, precision=hi) + b3


if __name__ == "__main__":
    key = jax.random.PRNGKey(0)
    kx, kp = jax.random.split(key)
    params = init_params(kp)

    # Small single-tile batch and a >1-tile batch (exercises batch padding and
    # the multi-step 'parallel' grid used for v7x megacore).
    for batch in (8, 192):
        kx, sub = jax.random.split(kx)
        x = jax.random.normal(sub, (batch, INPUT_DIM), jnp.float32)

        out = jax.block_until_ready(reward_model_forward(x, params))
        ref = reference_forward(x, params)

        assert out.shape == (batch, OUT_DIM), out.shape
        # Tolerance is kept loose on purpose: the f32 MXU contraction precision
        # differs slightly across TPU generations, while any structural bug
        # (wrong layout / missing bias / bad tiling) shows up as O(0.1..1)
        # errors and would still trip this check.
        assert jnp.allclose(out, ref, atol=1e-2, rtol=1e-2), (
            jnp.max(jnp.abs(out - ref)))

    print("KERNEL_OK")
</pallas_src>

<mosaic_0001>
module attributes {stable_mosaic.version = 11 : i64} {
  func.func @_mlp_kernel(%arg0: i32, %arg1: memref<6x128xf32, #tpu.memory_space<vmem>>, %arg2: memref<32x6xf32, #tpu.memory_space<vmem>>, %arg3: memref<16x32xf32, #tpu.memory_space<vmem>>, %arg4: memref<16x1xf32, #tpu.memory_space<vmem>>, %arg5: memref<16x1xf32, #tpu.memory_space<vmem>>, %arg6: memref<1x1xf32, #tpu.memory_space<vmem>>, %arg7: memref<1x128xf32, #tpu.memory_space<vmem>>) attributes {dimension_semantics = [#tpu.dimension_semantics<parallel>], iteration_bounds = array<i64: 1>, scalar_prefetch = 0 : i64, scratch_operands = 0 : i64, tpu.core_type = #tpu.core_type<tc>, window_params = [{transform_indices = @transform_0, window_bounds = array<i64: 6, 128>}, {pipeline_mode = #tpu.pipeline_mode<synchronous>, transform_indices = @transform_1, window_bounds = array<i64: 32, 6>}, {pipeline_mode = #tpu.pipeline_mode<synchronous>, transform_indices = @transform_2, window_bounds = array<i64: 16, 32>}, {pipeline_mode = #tpu.pipeline_mode<synchronous>, transform_indices = @transform_3, window_bounds = array<i64: 16, 1>}, {pipeline_mode = #tpu.pipeline_mode<synchronous>, transform_indices = @transform_4, window_bounds = array<i64: 16, 1>}, {pipeline_mode = #tpu.pipeline_mode<synchronous>, transform_indices = @transform_5, window_bounds = array<i64: 1, 1>}, {transform_indices = @transform_6, window_bounds = array<i64: 1, 128>}]} {
    %c0 = arith.constant 0 : index
    %c0_0 = arith.constant 0 : index
    %0 = vector.load %arg1[%c0, %c0_0] : memref<6x128xf32, #tpu.memory_space<vmem>>, vector<6x128xf32>
    %c0_1 = arith.constant 0 : index
    %c0_2 = arith.constant 0 : index
    %1 = vector.load %arg2[%c0_1, %c0_2] : memref<32x6xf32, #tpu.memory_space<vmem>>, vector<32x6xf32>
    %cst = arith.constant dense<0.000000e+00> : vector<32x128xf32>
    %2 = tpu.matmul %1, %0, %cst {dimension_numbers = #tpu.dot_dimension_numbers<[1], [0], [0], [1], [0, 0, 1, 1], [], []>} : vector<32x6xf32>, vector<6x128xf32>, vector<32x128xf32> -> vector<32x128xf32>
    %cst_3 = arith.constant 0.000000e+00 : f32
    %3 = vector.broadcast %cst_3 : f32 to vector<32x128xf32>
    %4 = arith.maximumf %2, %3 : vector<32x128xf32>
    %c0_4 = arith.constant 0 : index
    %c0_5 = arith.constant 0 : index
    %5 = vector.load %arg3[%c0_4, %c0_5] : memref<16x32xf32, #tpu.memory_space<vmem>>, vector<16x32xf32>
    %cst_6 = arith.constant dense<0.000000e+00> : vector<16x128xf32>
    %6 = tpu.matmul %5, %4, %cst_6 {dimension_numbers = #tpu.dot_dimension_numbers<[1], [0], [0], [1], [0, 0, 1, 1], [], []>} : vector<16x32xf32>, vector<32x128xf32>, vector<16x128xf32> -> vector<16x128xf32>
    %c0_7 = arith.constant 0 : index
    %c0_8 = arith.constant 0 : index
    %7 = vector.load %arg4[%c0_7, %c0_8] : memref<16x1xf32, #tpu.memory_space<vmem>>, vector<16x1xf32>
    %8 = vector.broadcast %7 : vector<16x1xf32> to vector<16x128xf32>
    %9 = arith.addf %6, %8 : vector<16x128xf32>
    %cst_9 = arith.constant 0.000000e+00 : f32
    %10 = vector.broadcast %cst_9 : f32 to vector<16x128xf32>
    %11 = arith.maximumf %9, %10 : vector<16x128xf32>
    %c0_10 = arith.constant 0 : index
    %c0_11 = arith.constant 0 : index
    %12 = vector.load %arg5[%c0_10, %c0_11] : memref<16x1xf32, #tpu.memory_space<vmem>>, vector<16x1xf32>
    %13 = vector.broadcast %12 : vector<16x1xf32> to vector<16x128xf32>
    %14 = arith.mulf %11, %13 : vector<16x128xf32>
    %cst_12 = arith.constant dense<0.000000e+00> : vector<128xf32>
    %15 = vector.multi_reduction <add>, %14, %cst_12 [0] : vector<16x128xf32> to vector<128xf32>
    %16 = vector.shape_cast %15 : vector<128xf32> to vector<1x128xf32>
    %c0_13 = arith.constant 0 : index
    %c0_14 = arith.constant 0 : index
    %17 = vector.load %arg6[%c0_13, %c0_14] : memref<1x1xf32, #tpu.memory_space<vmem>>, vector<1x1xf32>
    %18 = vector.broadcast %17 : vector<1x1xf32> to vector<1x128xf32>
    %19 = arith.addf %16, %18 : vector<1x128xf32>
    %c0_15 = arith.constant 0 : index
    %c0_16 = arith.constant 0 : index
    %20 = vector.load %arg7[%c0_15, %c0_16] : memref<1x128xf32, #tpu.memory_space<vmem>>, vector<1x128xf32>
    tpu.vector_store %arg7[%c0_15, %c0_16], %19 {strides = array<i32>} : memref<1x128xf32, #tpu.memory_space<vmem>>, vector<1x128xf32>,
    return
  }
  func.func @transform_0(%arg0: i32) -> (i32, i32) {
    %c0_i32 = arith.constant 0 : i32
    %c0_i32_0 = arith.constant 0 : i32
    return %c0_i32, %arg0 : i32, i32
  }
  func.func @transform_1(%arg0: i32) -> (i32, i32) {
    %c0_i32 = arith.constant 0 : i32
    %c0_i32_0 = arith.constant 0 : i32
    %c0_i32_1 = arith.constant 0 : i32
    return %c0_i32, %c0_i32_0 : i32, i32
  }
  func.func @transform_2(%arg0: i32) -> (i32, i32) {
    %c0_i32 = arith.constant 0 : i32
    %c0_i32_0 = arith.constant 0 : i32
    %c0_i32_1 = arith.constant 0 : i32
    return %c0_i32, %c0_i32_0 : i32, i32
  }
  func.func @transform_3(%arg0: i32) -> (i32, i32) {
    %c0_i32 = arith.constant 0 : i32
    %c0_i32_0 = arith.constant 0 : i32
    %c0_i32_1 = arith.constant 0 : i32
    return %c0_i32, %c0_i32_0 : i32, i32
  }
  func.func @transform_4(%arg0: i32) -> (i32, i32) {
    %c0_i32 = arith.constant 0 : i32
    %c0_i32_0 = arith.constant 0 : i32
    %c0_i32_1 = arith.constant 0 : i32
    return %c0_i32, %c0_i32_0 : i32, i32
  }
  func.func @transform_5(%arg0: i32) -> (i32, i32) {
    %c0_i32 = arith.constant 0 : i32
    %c0_i32_0 = arith.constant 0 : i32
    %c0_i32_1 = arith.constant 0 : i32
    return %c0_i32, %c0_i32_0 : i32, i32
  }
  func.func @transform_6(%arg0: i32) -> (i32, i32) {
    %c0_i32 = arith.constant 0 : i32
    %c0_i32_0 = arith.constant 0 : i32
    return %c0_i32, %arg0 : i32, i32
  }
}

</mosaic_0001>

<bundles_post_ra>
// kernel: reward_model_forward.1
= control target key start
LH: loop header
LB: loop body
LE: loop exit
PB: predicated region body
PF: predicated region fallthrough
CT: control target
= control target key end

     0   :  { %vm43_vm0 = vcmask 1045504   ;;  %vm30_vm1 = vcmask 48128   ;;  %vm150_vm2 = vcmask 261120   ;;  %v311_v6 = vmov 0   ;;  %s388_s0 = inlined_call_operand.vmem [shape: f32[6,128], index: 0, kind: input, shape index: {}]   ;;  %s389_s1 = inlined_call_operand.vmem [shape: f32[32,6], index: 1, kind: input, shape index: {}]   ;;  %s390_s2 = inlined_call_operand.vmem [shape: f32[16,32], index: 2, kind: input, shape index: {}]   ;;  %s391_s3 = inlined_call_operand.vmem [shape: f32[16,1], index: 3, kind: input, shape index: {}]   ;;  %s392_s4 = inlined_call_operand.vmem [shape: f32[16,1], index: 4, kind: input, shape index: {}]   ;;  %s393_s5 = inlined_call_operand.<no memory space> [shape: f32[1,1], index: 5, kind: input, shape index: {}]   ;;  %s394_s6 = inlined_call_operand.vmem [shape: f32[1,128], index: 6, kind: output, shape index: {}]  }
   0x1   :  { %v25_v0 = vld [vmem:[%s388_s0] sm:$0x3f]  ;;  %v27_v2 = vld [vmem:[%s389_s1 + $0x8] sm:$0xff]  ;;  %v28_v3 = vld [vmem:[%s389_s1 + $0x10] sm:$0xff]  ;;  %309 = vset.pattern.permute.xlu0 %v311_v6  ;;  %310 = vset.pattern.permute.xlu1 %v311_v6  ;;  %v11_v9 = vstv %s393_s5  ;;  %v261_v34 = vlaneseq }
   0x2   :  { %v26_v1 = vld [vmem:[%s389_s1] sm:$0xff]  ;;  %289 = vmatprep.subr.msk.mxu0 %vm43_vm0, %v25_v0  ;;  %v29_v4 = vld [vmem:[%s389_s1 + $0x18] sm:$0xff]  ;;  %12 = vst [vmem:[#allocation2] sm:$0x1] %v11_v9  ;;  %v139_v10 = vld [vmem:[%s391_s3 + $0x8] sm:$0xff] }
   0x3   :  { %291 = vmatprep.mubr.msk.f32.mxu0 %vm30_vm1, %v26_v1  ;;  %290 = vmatpush3.msk.msra.mxu0 %vm43_vm0, %v25_v0  ;;  %v136_v5 = vld [vmem:[%s390_s2] sm:$0xff]  ;;  %v235_v11 = vld [vmem:[%s392_s4 + $0x8] sm:$0xff]  ;;  %v262_v37 = vshrl.u32 %v261_v34, 7 }
   0x4   :  { %292 = vmatmul.mubr.msk.f32.vlgmr.msra.gmra.mxu0 %vm30_vm1, %v27_v2  ;;  %305 = vmatprep.mubr.msk.f32.mxu1 %vm150_vm2, %v136_v5  ;;  %v138_v7 = vld [vmem:[%s391_s3] sm:$0xff]  ;;  %v137_v21 = vld [vmem:[%s390_s2 + $0x8] sm:$0xff] }
   0x5   :  { %294 = vmatprep.mubr.msk.f32.mxu0 %vm30_vm1, %v28_v3  ;;  %v234_v8 = vld [vmem:[%s392_s4] sm:$0xff]  ;;  %142 = vperm.xlu0 %309, %v138_v7   ;;  %v263_v40 = vsub.s32 0, %v262_v37 }
   0x6   :  { %238 = vperm.xlu1 %310, %v234_v8  }
   0x8   :  { %295 = vmatmul.mubr.msk.f32.gmra.mxu0 %vm30_vm1, %v29_v4 }
   0x9   :  { %147 = vperm.xlu0 %309, %v139_v10   ;;  %v255_v12 = vld [vmem:[#allocation2] sm:$0x1] }
   0xa   :  { %243 = vperm.xlu1 %310, %v235_v11  }
   0xd   :  { %258 = vperm.xlu0 %309, %v255_v12  }
  0x80   :  { %v143_v22 = vpop.permute.xlu0 %142 }
  0x81   :  { %v239_v23 = vpop.permute.xlu1 %238 }
  0x84   :  { %v148_v24 = vpop.permute.xlu0 %147 }
  0x85   :  { %v244_v31 = vpop.permute.xlu1 %243 }
  0x88   :  { %v259_v42 = vpop.permute.xlu0 %258 }
  0x89   :  { %v264_v44 = vrot.slane %v259_v42, %v263_v40 }
  0xc4   :  { %v293_v13 = vpop.f32.mrf.mxu0 }
  0xc5   :  { %v133_v19 = vmax.f32 %v293_v13, 0.0 }
  0xc6   :  { %v113_v14 = vpop.f32.mrf.mxu0 }
  0xc7   :  { %v132_v20 = vmax.f32 %v113_v14, 0.0 }
  0xc8   :  { %v296_v15 = vpop.f32.mrf.mxu0 }
  0xc9   :  { %v135_v16 = vmax.f32 %v296_v15, 0.0 }
  0xca   :  { %v123_v17 = vpop.f32.mrf.mxu0 }
  0xcb   :  { %v134_v18 = vmax.f32 %v123_v17, 0.0  ;;  %297 = vmatprep.subr.mxu1 %v135_v16 }
  0xcc   :  { %298 = vmatpush3.msra.mxu1 %v135_v16 }
  0xcd   :  { %299 = vmatprep.subr.mxu1 %v134_v18 }
  0xce   :  { %300 = vmatpush3.msra.mxu1 %v134_v18 }
  0xcf   :  { %301 = vmatprep.subr.mxu1 %v133_v19 }
  0xd0   :  { %302 = vmatpush3.msra.mxu1 %v133_v19 }
  0xd1   :  { %303 = vmatprep.subr.mxu1 %v132_v20 }
  0xd2   :  { %304 = vmatpush3.msra.mxu1 %v132_v20 }
  0xd3   :  { %306 = vmatmul.mubr.msk.f32.vlgmr.msra.gmra.mxu1 %vm150_vm2, %v137_v21 }
 0x193   :  { %v307_v25 = vpop.f32.mrf.mxu1 }
 0x194   :  { %v229_v26 = vadd.f32 %v307_v25, %v148_v24 }
 0x195   :  { %v223_v27 = vpop.f32.mrf.mxu1 }
 0x196   :  { %v233_v28 = vmax.f32 %v229_v26, 0.0  ;;  %v224_v29 = vadd.f32 %v223_v27, %v143_v22 }
 0x198   :  { %v232_v30 = vmax.f32 %v224_v29, 0.0  ;;  %v247_v32 = vmul.f32 %v244_v31, %v233_v28 }
 0x19a   :  { %v246_v33 = vmul.f32 %v239_v23, %v232_v30 }
 0x19c   :  { %v248_v35 = vadd.f32 %v247_v32, %v246_v33 }
 0x19e   :  { %v249_v36 = vrot.slane %v248_v35, 4 }
 0x1a0   :  { %v250_v38 = vadd.f32 %v249_v36, %v248_v35 }
 0x1a2   :  { %v251_v39 = vrot.slane %v250_v38, 2 }
 0x1a4   :  { %v252_v41 = vadd.f32 %v251_v39, %v250_v38 }
 0x1a6   :  { %v253_v43 = vrot.slane %v252_v41, 1 }
 0x1a8   :  { %v254_v45 = vadd.f32 %v253_v43, %v252_v41 }
 0x1aa   :  { %v265_v46 = vadd.f32 %v264_v44, %v254_v45 }
 0x1ac   :  { %266 = vst [vmem:[%s394_s6] sm:$0x1] %v265_v46 }

</bundles_post_ra>
